<compile_context>
chip_gen: v7x
topology: tpu7x:2x2x1
jax: 0.10.0
libtpu: 0.0.40
codegen_flags: <defaults>
</compile_context>

<pallas_src>
import functools

import jax
import jax.numpy as jnp
from jax.experimental import pallas as pl
from jax.experimental.pallas import tpu as pltpu


def out_conv_kernel(x_ref, w_ref, b_ref, o_ref):
    """One (batch, spatial-tile) block of the 1x1 conv.

    x_ref: (1, Cin, TS)  VMEM  lane-dense input activations
    w_ref: (Cout, Cin)   VMEM  conv weight (tiny resident tile, MXU LHS)
    b_ref: (Cout, 1)     VMEM  conv bias column (broadcast over lanes)
    o_ref: (1, Cout, TS) VMEM  lane-dense output activations
    """
    x = x_ref[0].astype(jnp.float32)        # (Cin, TS)
    w = w_ref[...].astype(jnp.float32)      # (Cout, Cin)
    # Entire channel contraction as one MXU matmul -> full (Cout, TS) result,
    # full 8-sublane vregs, one unmasked lane-dense store.  VPU only does the
    # bias add.
    y = jnp.dot(w, x, preferred_element_type=jnp.float32)   # (Cout, TS)
    o_ref[0] = (y + b_ref[...]).astype(o_ref.dtype)


@functools.partial(jax.jit, static_argnames=("ts",))
def out_conv_pallas(x_nchw, weight, bias, *, ts=131072):
    """1x1 conv (Conv2d kernel_size=1). x: (N, Cin, H, W); weight: (Cout, Cin); bias: (Cout,)."""
    N, Cin, H, W = x_nchw.shape
    Cout = weight.shape[0]
    HW = H * W

    # NCHW is already (N, Cin, H*W) for a 1x1 conv: pure metadata reshape.
    x3 = x_nchw.reshape(N, Cin, HW)

    # Lane-dense spatial tile: multiple of 128, clipped to the array extent.
    ts = max(128, (int(ts) // 128) * 128)
    ts = min(ts, pl.cdiv(HW, 128) * 128)
    # Uneven tail tile (HW % ts != 0) is handled by Pallas edge masking:
    # out-of-bounds output lanes are discarded, so no host pad / slice passes.
    num_s = pl.cdiv(HW, ts)

    w_f32 = weight.astype(jnp.float32)                    # (Cout, Cin) -> VMEM
    b_f32 = bias.astype(jnp.float32).reshape(Cout, 1)     # (Cout, 1)   -> VMEM

    out3 = pl.pallas_call(
        out_conv_kernel,
        out_shape=jax.ShapeDtypeStruct((N, Cout, HW), x_nchw.dtype),
        grid_spec=pltpu.PrefetchScalarGridSpec(
            num_scalar_prefetch=0,
            grid=(N, num_s),
            in_specs=[
                pl.BlockSpec((1, Cin, ts), lambda n, s: (n, 0, s)),
                # Weight / bias: tiny resident VMEM blocks (same block index
                # every step -> DMA'd once, stay resident across the grid).
                pl.BlockSpec((Cout, Cin), lambda n, s: (0, 0)),
                pl.BlockSpec((Cout, 1), lambda n, s: (0, 0)),
            ],
            out_specs=pl.BlockSpec((1, Cout, ts), lambda n, s: (n, 0, s)),
        ),
        compiler_params=pltpu.CompilerParams(
            # Both axes independent; on v7x this lets both TensorCores issue
            # DMAs for this HBM-bound op.
            dimension_semantics=("parallel", "parallel"),
            # Sized for v7x's 64 MiB physical VMEM (headroom for compiler
            # scratch); default-tile buffers are ~16 MiB double-buffered.
            vmem_limit_bytes=48 * 1024 * 1024,
        ),
    )(x3, w_f32, b_f32)

    return out3.reshape(N, Cout, H, W)


if __name__ == "__main__":
    # Small shapes consistent with OUT_CONV(in_channels=4, out_channels=8)
    N, Cin, H, W = 2, 4, 16, 16
    Cout = 8

    key = jax.random.PRNGKey(0)
    kx, kw, kb = jax.random.split(key, 3)

    x = jax.random.normal(kx, (N, Cin, H, W), dtype=jnp.float32)
    # Deterministic param init (PyTorch-like uniform bound 1/sqrt(fan_in))
    bound = 1.0 / (Cin ** 0.5)
    weight = jax.random.uniform(kw, (Cout, Cin), minval=-bound, maxval=bound,
                                dtype=jnp.float32)
    bias = jax.random.uniform(kb, (Cout,), minval=-bound, maxval=bound,
                              dtype=jnp.float32)

    y = out_conv_pallas(x, weight, bias)
    y = jax.block_until_ready(y)

    # Reference check in plain JAX (1x1 conv == channel matmul)
    y_ref = jnp.einsum("nchw,oc->nohw", x, weight) + bias[None, :, None, None]
    assert y.shape == (N, Cout, H, W)
    assert jnp.allclose(y, y_ref, atol=1e-5, rtol=1e-5)

    print("KERNEL_OK")
</pallas_src>

<mosaic_0001>
module attributes {stable_mosaic.version = 11 : i64} {
  func.func @out_conv_kernel(%arg0: i32, %arg1: i32, %arg2: memref<1x4x256xf32, #tpu.memory_space<vmem>>, %arg3: memref<8x4xf32, #tpu.memory_space<vmem>>, %arg4: memref<8x1xf32, #tpu.memory_space<vmem>>, %arg5: memref<1x8x256xf32, #tpu.memory_space<vmem>>) attributes {dimension_semantics = [#tpu.dimension_semantics<parallel>, #tpu.dimension_semantics<parallel>], iteration_bounds = array<i64: 2, 1>, scalar_prefetch = 0 : i64, scratch_operands = 0 : i64, tpu.core_type = #tpu.core_type<tc>, window_params = [{transform_indices = @transform_0, window_bounds = array<i64: 1, 4, 256>}, {pipeline_mode = #tpu.pipeline_mode<synchronous>, transform_indices = @transform_1, window_bounds = array<i64: 8, 4>}, {pipeline_mode = #tpu.pipeline_mode<synchronous>, transform_indices = @transform_2, window_bounds = array<i64: 8, 1>}, {transform_indices = @transform_3, window_bounds = array<i64: 1, 8, 256>}]} {
    %c0 = arith.constant 0 : index
    %c0_0 = arith.constant 0 : index
    %c0_1 = arith.constant 0 : index
    %0 = vector.load %arg2[%c0, %c0_0, %c0_1] : memref<1x4x256xf32, #tpu.memory_space<vmem>>, vector<1x4x256xf32>
    %1 = vector.shape_cast %0 : vector<1x4x256xf32> to vector<4x256xf32>
    %c0_2 = arith.constant 0 : index
    %c0_3 = arith.constant 0 : index
    %2 = vector.load %arg3[%c0_2, %c0_3] : memref<8x4xf32, #tpu.memory_space<vmem>>, vector<8x4xf32>
    %cst = arith.constant dense<0.000000e+00> : vector<8x256xf32>
    %3 = tpu.matmul %2, %1, %cst {dimension_numbers = #tpu.dot_dimension_numbers<[1], [0], [0], [1], [0, 0, 1, 1], [], []>} : vector<8x4xf32>, vector<4x256xf32>, vector<8x256xf32> -> vector<8x256xf32>
    %c0_4 = arith.constant 0 : index
    %c0_5 = arith.constant 0 : index
    %4 = vector.load %arg4[%c0_4, %c0_5] : memref<8x1xf32, #tpu.memory_space<vmem>>, vector<8x1xf32>
    %5 = vector.broadcast %4 : vector<8x1xf32> to vector<8x256xf32>
    %6 = arith.addf %3, %5 : vector<8x256xf32>
    %c0_6 = arith.constant 0 : index
    %c0_7 = arith.constant 0 : index
    %c0_8 = arith.constant 0 : index
    %7 = vector.load %arg5[%c0_6, %c0_7, %c0_8] : memref<1x8x256xf32, #tpu.memory_space<vmem>>, vector<1x8x256xf32>
    %8 = vector.shape_cast %7 : vector<1x8x256xf32> to vector<8x256xf32>
    %9 = vector.shape_cast %6 : vector<8x256xf32> to vector<1x8x256xf32>
    tpu.vector_store %arg5[%c0_6, %c0_7, %c0_8], %9 {strides = array<i32>} : memref<1x8x256xf32, #tpu.memory_space<vmem>>, vector<1x8x256xf32>,
    return
  }
  func.func @transform_0(%arg0: i32, %arg1: i32) -> (i32, i32, i32) {
    %c0_i32 = arith.constant 0 : i32
    %c0_i32_0 = arith.constant 0 : i32
    return %arg0, %c0_i32, %arg1 : i32, i32, i32
  }
  func.func @transform_1(%arg0: i32, %arg1: i32) -> (i32, i32) {
    %c0_i32 = arith.constant 0 : i32
    %c0_i32_0 = arith.constant 0 : i32
    %c0_i32_1 = arith.constant 0 : i32
    return %c0_i32, %c0_i32_0 : i32, i32
  }
  func.func @transform_2(%arg0: i32, %arg1: i32) -> (i32, i32) {
    %c0_i32 = arith.constant 0 : i32
    %c0_i32_0 = arith.constant 0 : i32
    %c0_i32_1 = arith.constant 0 : i32
    return %c0_i32, %c0_i32_0 : i32, i32
  }
  func.func @transform_3(%arg0: i32, %arg1: i32) -> (i32, i32, i32) {
    %c0_i32 = arith.constant 0 : i32
    %c0_i32_0 = arith.constant 0 : i32
    return %arg0, %c0_i32, %arg1 : i32, i32, i32
  }
}

</mosaic_0001>

<bundles_post_ra>
// kernel: out_conv_pallas.1
= control target key start
LH: loop header
LB: loop body
LE: loop exit
PB: predicated region body
PF: predicated region fallthrough
CT: control target
= control target key end

     0   :  { %s479_s12 = smov 0   ;;  %s481_s13 = smov 0   ;;  %s518_s0 = inlined_call_operand.vmem [shape: f32[2,4,256], index: 0, kind: input, shape index: {}]   ;;  %s519_s1 = inlined_call_operand.vmem [shape: f32[8,4], index: 1, kind: input, shape index: {}]   ;;  %s520_s2 = inlined_call_operand.vmem [shape: f32[8,1], index: 2, kind: input, shape index: {}]   ;;  %s521_s3 = inlined_call_operand.vmem [shape: f32[2,8,256], index: 3, kind: output, shape index: {}]  }
   0x1   :  { %s483_s14 = smov 0  }
   0x2 LB: > { %s25_s15 = sadd.s32 1, %s451_s13  ;;  %p393_p0 = scmp.ge.s32.totalorder %s455_s14, 1  ;;  %s455_s14 = sphi %s483_s14, %s13_s14   ;;  %s451_s13 = sphi %s481_s13, %s523_s13   ;;  %s447_s12 = sphi %s479_s12, %s522_s12  }
   0x3   : > { %p27_p1 = scmp.ge.s32.totalorder %s25_s15, 2  ;;  %p158_p2 = scmp.lt.s32.totalorder %s455_s14, 3 }
   0x5   : > { %s525_s15 = smov (%p27_p1, %s25_s15), 0  ;;  %p159_p3 = pnand %p393_p0, %p158_p2 }
   0x6   : > { %p191_p4 = scmp.lt.s32.totalorder (!%p159_p3), %s447_s12, 1  ;;  %v457_v0 = vmov (!%p159_p3), 0.0   ;;  %v458_v1 = vmov (!%p159_p3), 0   ;;  %v212_v2 = vld [vmem:[%s520_s2] sm:$0xff] (!%p159_p3)  ;;  %vm224_vm0 = vcmask (!%p159_p3), 1043456   ;;  %vm220_vm1 = vcmask (!%p159_p3), 31744  }
   0x7   : > { %162 = sbr.rel (%p159_p3) target bundleno = 238 (0xee), region = 32  ;;  %293 = vmatprep.mubr.f32.mxu0 (!%p159_p3), %v457_v0  ;;  %431 = vset.pattern.permute.xlu0 (!%p159_p3), %v458_v1  ;;  %v211_v5 = vld [vmem:[%s519_s1] sm:$0xff] (!%p159_p3) }
   0x8   : > { %215 = vperm.xlu0 (!%p159_p3), %431, %v212_v2  }
   0xe   : > { %s527_s12 = smov (!%p191_p4, %s447_s12), 1 }
   0xf   : > { %s403_s18 = sshll.u32 %s527_s12, 3  ;;  %s404_s24 = sshll.u32 %s527_s12, 4 }
  0x10   : > { %s198_s21 = scalar_lea.vmem %s518_s0, %s403_s18  ;;  %s208_s27 = scalar_lea.vmem %s521_s3, %s404_s24 }
  0x11   : > { %v210_v3 = vld [vmem:[%s198_s21] sm:$0xff] }
  0x12   : > { %v219_v4 = vcombine.high %v210_v3, %v210_v3 }
  0x14   : > { %398 = vmatprep.subr.msk.mxu0 %vm224_vm0, %v219_v4 }
  0x15   : > { %399 = vmatpush1.msk.msra.mxu0 %vm224_vm0, %v210_v3 }
  0x16   : > { %400 = vmatmul.mubr.msk.f32.vlgmr.msra.gmra.mrb[0].mxu0 %vm220_vm1, %v211_v5 }
  0x87   : > { %v216_v6 = vpop.permute.xlu0 %215 }
  0xe9   : > { %v295_v7 = vpop.f32.mrb[0].mxu0 }
  0xea   : > { %v296_v8 = vadd.f32 %v295_v7, %v216_v6  ;;  %v297_v9 = vpop.f32.mrb[1].mxu0 }
  0xeb   : > { %v298_v10 = vadd.f32 %v297_v9, %v216_v6 }
  0xec   : > { %300 = vst [vmem:[%s208_s27] sm:$0xff] %v296_v8 }
  0xed   : > { %301 = vst [vmem:[%s208_s27 + $0x8] sm:$0xff] %v298_v10 }
  0xee PF: > { %s13_s14 = sadd.s32 1, %s455_s14   ;;  %s522_s12 = smov %s451_s13 }
  0xef   : > { %p10_p5 = scmp.ge.s32.totalorder %s13_s14, 4   ;;  %s523_s13 = smov %s525_s15 }
  0xf1   :  { %12 = sbr.rel (!%p10_p5) target bundleno = 2 (0x2), region = 62 }

</bundles_post_ra>
